<compile_context>
chip_gen: v7x
topology: tpu7x:2x2x1
jax: 0.10.0
libtpu: 0.0.40
codegen_flags: <defaults>
</compile_context>

<pallas_src>
import jax
import jax.numpy as jnp
from jax.experimental import pallas as pl
from jax.experimental.pallas import tpu as pltpu

NUM_INPUTS = 784      # 1 * 28 * 28
NUM_OUTPUTS = 10
PADDED_OUT = 128      # lane-dense resident weight width
BLOCK_ROWS = 2048     # batch tile (rows) per grid step
_MIN_SPLIT_ROWS = 256 # only split a single-step batch if each half >= this
_VMEM_LIMIT = 32 * 1024 * 1024


def _linear_kernel(x_ref, w_ref, b_ref, o_ref):
    # x_ref: (TB, 784) f32      w_ref: (784, 128) f32 (cols 10..127 are zero)
    # b_ref: (1, 10)   f32      o_ref: (TB, 10)   f32
    acc = jnp.dot(x_ref[...], w_ref[...], preferred_element_type=jnp.float32)
    o_ref[...] = acc[:, :NUM_OUTPUTS] + b_ref[...]


def prepare_linear_params(weight, bias):
    """One-time prep (outside the per-forward path): transpose the torch
    (out, in) weight to (in, out) and zero-pad the out dim to 128 lanes."""
    w_io = jnp.zeros((NUM_INPUTS, PADDED_OUT), dtype=jnp.float32)
    w_io = w_io.at[:, :NUM_OUTPUTS].set(weight.T.astype(jnp.float32))
    b2d = bias.astype(jnp.float32).reshape(1, NUM_OUTPUTS)
    return w_io, b2d


def _pick_tile(batch, block_rows):
    tb = min(block_rows, batch)
    # Single-step grid but a big batch: halve the tile so the "parallel" batch
    # axis can shard across v7x's two TensorCores (multiple of 8 rows).
    if batch <= block_rows and batch >= 2 * _MIN_SPLIT_ROWS:
        half = (batch + 1) // 2
        tb = ((half + 7) // 8) * 8
    return tb


def linear_net_forward(x_nchw, w_padded, bias2d, *, block_rows=BLOCK_ROWS):
    """Forward pass of LinearNet.

    x_nchw   : (B, C, H, W) float32 with C*H*W == NUM_INPUTS
    w_padded : (NUM_INPUTS, PADDED_OUT) float32 from prepare_linear_params
    bias2d   : (1, NUM_OUTPUTS) float32 from prepare_linear_params
    returns  : (B, NUM_OUTPUTS) float32 logits
    """
    batch = x_nchw.shape[0]
    in_features = NUM_INPUTS
    out_features = NUM_OUTPUTS

    # torch x.view(x.shape[0], -1): metadata-only reshape, native f32.
    x2d = x_nchw.reshape(batch, -1)

    tb = _pick_tile(batch, block_rows)
    grid = (pl.cdiv(batch, tb),)

    cost = pl.CostEstimate(
        flops=2 * batch * in_features * PADDED_OUT,
        transcendentals=0,
        bytes_accessed=(batch * in_features * 4            # x (f32)
                        + in_features * PADDED_OUT * 4     # w (f32, resident)
                        + out_features * 4                 # bias
                        + batch * out_features * 4),       # output (unpadded)
    )

    return pl.pallas_call(
        _linear_kernel,
        out_shape=jax.ShapeDtypeStruct((batch, out_features), jnp.float32),
        grid=grid,
        in_specs=[
            # x: tiled along batch, streamed / double-buffered.
            pl.BlockSpec((tb, in_features), lambda i: (i, 0),
                         memory_space=pltpu.MemorySpace.VMEM),
            # weight: resident across grid iterations.
            pl.BlockSpec((in_features, PADDED_OUT), lambda i: (0, 0),
                         memory_space=pltpu.MemorySpace.VMEM),
            # bias: resident across grid iterations.
            pl.BlockSpec((1, out_features), lambda i: (0, 0),
                         memory_space=pltpu.MemorySpace.VMEM),
        ],
        out_specs=pl.BlockSpec((tb, out_features), lambda i: (i, 0),
                               memory_space=pltpu.MemorySpace.VMEM),
        compiler_params=pltpu.CompilerParams(
            dimension_semantics=("parallel",),
            vmem_limit_bytes=_VMEM_LIMIT),
        cost_estimate=cost,
    )(x2d, w_padded, bias2d)


if __name__ == "__main__":
    key = jax.random.PRNGKey(0)
    k_x, k_w, k_b = jax.random.split(key, 3)

    batch = 8
    # Input consistent with the module: MNIST-style NCHW images (B, 1, 28, 28)
    x = jax.random.normal(k_x, (batch, 1, 28, 28), dtype=jnp.float32)

    # Deterministic parameters matching torch nn.Linear shapes:
    #   weight: (out_features, in_features), bias: (out_features,)
    bound = 1.0 / (NUM_INPUTS ** 0.5)
    weight = jax.random.uniform(
        k_w, (NUM_OUTPUTS, NUM_INPUTS), dtype=jnp.float32,
        minval=-bound, maxval=bound)
    bias = jax.random.uniform(
        k_b, (NUM_OUTPUTS,), dtype=jnp.float32, minval=-bound, maxval=bound)

    # One-time param prep (transpose + lane-pad), then the forward.
    w_padded, bias2d = prepare_linear_params(weight, bias)
    y = linear_net_forward(x, w_padded, bias2d)
    jax.block_until_ready(y)

    # Reference check in plain JAX (f32). Kernel is f32 end-to-end now, so the
    # tolerance can be tight.
    y_ref = x.reshape(batch, -1) @ weight.T + bias
    assert y.shape == (batch, NUM_OUTPUTS)
    assert y.dtype == jnp.float32
    assert jnp.allclose(y, y_ref, atol=1e-3, rtol=1e-3)

    print("KERNEL_OK")
</pallas_src>

<mosaic_0001>
module attributes {stable_mosaic.version = 11 : i64} {
  func.func @_linear_kernel(%arg0: i32, %arg1: memref<8x784xf32, #tpu.memory_space<vmem>>, %arg2: memref<784x128xf32, #tpu.memory_space<vmem>>, %arg3: memref<1x10xf32, #tpu.memory_space<vmem>>, %arg4: memref<8x10xf32, #tpu.memory_space<vmem>>) attributes {dimension_semantics = [#tpu.dimension_semantics<parallel>], iteration_bounds = array<i64: 1>, scalar_prefetch = 0 : i64, scratch_operands = 0 : i64, tpu.core_type = #tpu.core_type<tc>, window_params = [{transform_indices = @transform_0, window_bounds = array<i64: 8, 784>}, {pipeline_mode = #tpu.pipeline_mode<synchronous>, transform_indices = @transform_1, window_bounds = array<i64: 784, 128>}, {pipeline_mode = #tpu.pipeline_mode<synchronous>, transform_indices = @transform_2, window_bounds = array<i64: 1, 10>}, {transform_indices = @transform_3, window_bounds = array<i64: 8, 10>}]} {
    %c0 = arith.constant 0 : index
    %c0_0 = arith.constant 0 : index
    %0 = vector.load %arg1[%c0, %c0_0] : memref<8x784xf32, #tpu.memory_space<vmem>>, vector<8x784xf32>
    %c0_1 = arith.constant 0 : index
    %c0_2 = arith.constant 0 : index
    %1 = vector.load %arg2[%c0_1, %c0_2] : memref<784x128xf32, #tpu.memory_space<vmem>>, vector<784x128xf32>
    %cst = arith.constant dense<0.000000e+00> : vector<8x128xf32>
    %2 = tpu.matmul %0, %1, %cst {dimension_numbers = #tpu.dot_dimension_numbers<[1], [0], [0], [1], [0, 0, 1, 1], [], []>} : vector<8x784xf32>, vector<784x128xf32>, vector<8x128xf32> -> vector<8x128xf32>
    %3 = vector.extract_strided_slice %2 {offsets = [0, 0], sizes = [8, 10], strides = [1, 1]} : vector<8x128xf32> to vector<8x10xf32>
    %c0_3 = arith.constant 0 : index
    %c0_4 = arith.constant 0 : index
    %4 = vector.load %arg3[%c0_3, %c0_4] : memref<1x10xf32, #tpu.memory_space<vmem>>, vector<1x10xf32>
    %5 = vector.broadcast %4 : vector<1x10xf32> to vector<8x10xf32>
    %6 = arith.addf %3, %5 : vector<8x10xf32>
    %c0_5 = arith.constant 0 : index
    %c0_6 = arith.constant 0 : index
    %7 = vector.load %arg4[%c0_5, %c0_6] : memref<8x10xf32, #tpu.memory_space<vmem>>, vector<8x10xf32>
    tpu.vector_store %arg4[%c0_5, %c0_6], %6 {strides = array<i32>} : memref<8x10xf32, #tpu.memory_space<vmem>>, vector<8x10xf32>,
    return
  }
  func.func @transform_0(%arg0: i32) -> (i32, i32) {
    %c0_i32 = arith.constant 0 : i32
    %c0_i32_0 = arith.constant 0 : i32
    return %arg0, %c0_i32 : i32, i32
  }
  func.func @transform_1(%arg0: i32) -> (i32, i32) {
    %c0_i32 = arith.constant 0 : i32
    %c0_i32_0 = arith.constant 0 : i32
    %c0_i32_1 = arith.constant 0 : i32
    return %c0_i32, %c0_i32_0 : i32, i32
  }
  func.func @transform_2(%arg0: i32) -> (i32, i32) {
    %c0_i32 = arith.constant 0 : i32
    %c0_i32_0 = arith.constant 0 : i32
    %c0_i32_1 = arith.constant 0 : i32
    return %c0_i32, %c0_i32_0 : i32, i32
  }
  func.func @transform_3(%arg0: i32) -> (i32, i32) {
    %c0_i32 = arith.constant 0 : i32
    %c0_i32_0 = arith.constant 0 : i32
    return %arg0, %c0_i32 : i32, i32
  }
}

</mosaic_0001>

<bundles_post_ra>
// kernel: tpu_custom_call.1
= control target key start
LH: loop header
LB: loop body
LE: loop exit
PB: predicated region body
PF: predicated region fallthrough
CT: control target
= control target key end

     0   :  { %8 = vsyncpa [#allocation3], 0  ;;  %s826_s0 = inlined_call_operand.hbm [shape: f32[8,784], index: 0, kind: input, shape index: {}]   ;;  %s827_s1 = inlined_call_operand.hbm [shape: f32[784,128], index: 1, kind: input, shape index: {}]   ;;  %s828_s2 = inlined_call_operand.vmem [shape: f32[1,10], index: 2, kind: input, shape index: {}]   ;;  %s829_s3 = inlined_call_operand.hbm [shape: f32[8,10], index: 3, kind: output, shape index: {}]  }
   0x1   :  { %9 = vsyncpa [#allocation6], 0 }
   0x2   :  { %10 = vsyncpa [#allocation4], 0  ;;  %s752_s12 = smov [#allocation2]   ;;  %s753_s14 = smov [#allocation5]  }
   0x3   :  { %s17_s13 = sshll.u32 %s752_s12, 4  ;;  %s26_s15 = sshll.u32 %s753_s14, 4  ;;  %s18_s13 = int_to_ptr.vmem [resolvable:$true] %s17_s13  ;;  %s780_s15 = int_to_ptr.vmem [resolvable:$true] %s26_s15 }
   0x4   :  { %s680_s18 = scalar_lea.hbm %s826_s0, 896 }
   0x5   :  { %p681_p0 = scmp.ne.s32.totalorder %s826_s0, %s680_s18  ;;  %p684_p1 = scmp.lt.u32.totalorder %s680_s18, %s826_s0 }
   0x7   :  { %p686_p2 = pnand %p684_p1, %p681_p0 }
   0x9   :  { %689 = shalt.err (!%p686_p2)
}
   0xa   :  { %s690_s23 = scalar_lea.vmem %s18_s13, 896  ;;  %p695_p4 = scmp.lt.s32.totalorder %s18_s13, %s18_s13 }
   0xb   :  { %p691_p3 = scmp.ne.s32.totalorder %s18_s13, %s690_s23  ;;  %p696_p5 = scmp.lt.s32.totalorder %s690_s23, %s690_s23 }
   0xd   :  { %p697_p6 = por %p696_p5, %p695_p4 }
   0xf   :  { %p698_p7 = pnand %p697_p6, %p691_p3 }
  0x11   :  { %701 = shalt.err (!%p698_p7)
}
  0x12   :  { %20 = dma.hbm_to_vmem [thread:$0]  %s826_s0, 896, %s18_s13, [#allocation3]  }
  0x13   :  { %s702_s28 = scalar_lea.hbm %s827_s1, 12544 }
  0x14   :  { %p703_p8 = scmp.ne.s32.totalorder %s827_s1, %s702_s28  ;;  %p706_p9 = scmp.lt.u32.totalorder %s702_s28, %s827_s1 }
  0x16   :  { %p708_p10 = pnand %p706_p9, %p703_p8 }
  0x18   :  { %711 = shalt.err (!%p708_p10)
}
  0x19   :  { %s712_s6 = scalar_lea.vmem %s780_s15, 12544  ;;  %p717_p12 = scmp.lt.s32.totalorder %s780_s15, %s780_s15 }
  0x1a   :  { %p713_p11 = scmp.ne.s32.totalorder %s780_s15, %s712_s6  ;;  %p718_p13 = scmp.lt.s32.totalorder %s712_s6, %s712_s6 }
  0x1c   :  { %p719_p0 = por %p718_p13, %p717_p12 }
  0x1e   :  { %p720_p1 = pnand %p719_p0, %p713_p11 }
  0x20   :  { %723 = shalt.err (!%p720_p1)
}
  0x21   :  { %s754_s0 = smov 128   ;;  %s755_s7 = smov 8  }
  0x22   :  { %32 = dma.hbm_to_vmem [thread:$0]  %s827_s1, 12544, %s780_s15, [#allocation6], %s754_s0, %s754_s0, %s755_s7  }
  0x23   :  { %746 = dma.done.wait [#allocation3], 896  }
  0x24   :  { %747 = vsyncadd [#allocation3], 4294966400 }
  0x25   :  { %748 = dma.done.wait [#allocation6], 12544  }
  0x26   :  { %749 = vsyncadd [#allocation6], 4294954752  ;;  %v64_v0 = vld [vmem:[#allocation5 + $0x80] sm:$0xff]  ;;  %v65_v1 = vld [vmem:[#allocation5 + $0x88] sm:$0xff]  ;;  %vm757_vm0 = vmmov 0   ;;  %vm146_vm1 = vcmask 130048  }
  0x27   :  { %v96_v2 = vld [vmem:[#allocation5 + $0x180] sm:$0xff]  ;;  %v573_v3 = vpack.c.bf16 %v65_v1, %v64_v0  ;;  %v97_v4 = vld [vmem:[#allocation5 + $0x188] sm:$0xff]  ;;  %v66_v11 = vld [vmem:[#allocation5 + $0x90] sm:$0xff]  ;;  %s759_s11 = smov [#allocation7]   ;;  %vm438_vm2 = vcmask 80896  }
  0x28   :  { %v48_v5 = vld [vmem:[#allocation5] sm:$0xff]  ;;  %v49_v6 = vld [vmem:[#allocation5 + $0x8] sm:$0xff]  ;;  %v605_v7 = vpack.c.bf16 %v97_v4, %v96_v2  ;;  %v67_v13 = vld [vmem:[#allocation5 + $0x98] sm:$0xff]  ;;  %s446_s12 = sshll.u32 %s759_s11, 4  ;;  %s447_s12 = int_to_ptr.vmem [resolvable:$true] %s446_s12 }
  0x29   :  { %v575_v8 = vpack.c.bf16 %v49_v6, %v48_v5  ;;  %v80_v9 = vld [vmem:[#allocation5 + $0x100] sm:$0xff]  ;;  %v81_v10 = vld [vmem:[#allocation5 + $0x108] sm:$0xff]  ;;  %574 = vmatprep.subr.bf16.mxu0 %v573_v3  ;;  %v98_v14 = vld [vmem:[#allocation5 + $0x190] sm:$0xff]  ;;  %v577_v16 = vpack.c.bf16 %v67_v13, %v66_v11  ;;  %s724_s13 = scalar_lea.vmem %s447_s12, 128  ;;  %p729_p3 = scmp.lt.s32.totalorder %s447_s12, %s447_s12 }
  0x2a   :  { %v607_v12 = vpack.c.bf16 %v81_v10, %v80_v9  ;;  %v99_v15 = vld [vmem:[#allocation5 + $0x198] sm:$0xff]  ;;  %606 = vmatprep.subr.bf16.mxu1 %v605_v7  ;;  %v50_v18 = vld [vmem:[#allocation5 + $0x10] sm:$0xff]  ;;  %v68_v23 = vld [vmem:[#allocation5 + $0xa0] sm:$0xff]  ;;  %p725_p2 = scmp.ne.s32.totalorder %s447_s12, %s724_s13  ;;  %p730_p4 = scmp.lt.s32.totalorder %s724_s13, %s724_s13 }
  0x2b   :  { %576 = vmatpush3.bf16.msra.mxu0 %v575_v8  ;;  %v609_v17 = vpack.c.bf16 %v99_v15, %v98_v14  ;;  %v51_v19 = vld [vmem:[#allocation5 + $0x18] sm:$0xff]  ;;  %v82_v20 = vld [vmem:[#allocation5 + $0x110] sm:$0xff]  ;;  %v69_v24 = vld [vmem:[#allocation5 + $0xa8] sm:$0xff] }
  0x2c   :  { %608 = vmatpush3.bf16.msra.mxu1 %v607_v12  ;;  %v579_v21 = vpack.c.bf16 %v51_v19, %v50_v18  ;;  %v83_v22 = vld [vmem:[#allocation5 + $0x118] sm:$0xff]  ;;  %578 = vmatprep.subr.bf16.mxu0 %v577_v16  ;;  %v581_v26 = vpack.c.bf16 %v69_v24, %v68_v23  ;;  %v100_v27 = vld [vmem:[#allocation5 + $0x1a0] sm:$0xff]  ;;  %v101_v28 = vld [vmem:[#allocation5 + $0x1a8] sm:$0xff]  ;;  %p731_p5 = por %p730_p4, %p729_p3 }
  0x2d   :  { %610 = vmatprep.subr.bf16.mxu1 %v609_v17  ;;  %v611_v25 = vpack.c.bf16 %v83_v22, %v82_v20  ;;  %v52_v29 = vld [vmem:[#allocation5 + $0x20] sm:$0xff]  ;;  %v613_v30 = vpack.c.bf16 %v101_v28, %v100_v27  ;;  %v53_v31 = vld [vmem:[#allocation5 + $0x28] sm:$0xff]  ;;  %v70_v35 = vld [vmem:[#allocation5 + $0xb0] sm:$0xff] }
  0x2e   :  { %v84_v32 = vld [vmem:[#allocation5 + $0x120] sm:$0xff]  ;;  %v85_v33 = vld [vmem:[#allocation5 + $0x128] sm:$0xff]  ;;  %v583_v34 = vpack.c.bf16 %v53_v31, %v52_v29  ;;  %v71_v36 = vld [vmem:[#allocation5 + $0xb8] sm:$0xff]  ;;  %p732_p6 = pnand %p731_p5, %p725_p2 }
  0x2f   :  { %580 = vmatpush3.bf16.msra.mxu0 %v579_v21  ;;  %v102_v37 = vld [vmem:[#allocation5 + $0x1b0] sm:$0xff]  ;;  %v615_v38 = vpack.c.bf16 %v85_v33, %v84_v32  ;;  %v585_v39 = vpack.c.bf16 %v71_v36, %v70_v35  ;;  %v103_v40 = vld [vmem:[#allocation5 + $0x1b8] sm:$0xff]  ;;  %v72_v46 = vld [vmem:[#allocation5 + $0xc0] sm:$0xff] }
  0x30   :  { %612 = vmatpush3.bf16.msra.mxu1 %v611_v25  ;;  %582 = vmatprep.subr.bf16.mxu0 %v581_v26  ;;  %v54_v41 = vld [vmem:[#allocation5 + $0x30] sm:$0xff]  ;;  %v55_v42 = vld [vmem:[#allocation5 + $0x38] sm:$0xff]  ;;  %v617_v43 = vpack.c.bf16 %v103_v40, %v102_v37  ;;  %v73_v47 = vld [vmem:[#allocation5 + $0xc8] sm:$0xff] }
  0x31   :  { %614 = vmatprep.subr.bf16.mxu1 %v613_v30  ;;  %v86_v44 = vld [vmem:[#allocation5 + $0x130] sm:$0xff]  ;;  %v87_v45 = vld [vmem:[#allocation5 + $0x138] sm:$0xff]  ;;  %v104_v48 = vld [vmem:[#allocation5 + $0x1c0] sm:$0xff]  ;;  %v587_v50 = vpack.c.bf16 %v55_v42, %v54_v41  ;;  %v589_v52 = vpack.c.bf16 %v73_v47, %v72_v46 }
  0x32   :  { %v105_v49 = vld [vmem:[#allocation5 + $0x1c8] sm:$0xff]  ;;  %v619_v51 = vpack.c.bf16 %v87_v45, %v86_v44  ;;  %v56_v53 = vld [vmem:[#allocation5 + $0x40] sm:$0xff]  ;;  %v74_v58 = vld [vmem:[#allocation5 + $0xd0] sm:$0xff] }
  0x33   :  { %584 = vmatpush3.bf16.msra.mxu0 %v583_v34  ;;  %v57_v54 = vld [vmem:[#allocation5 + $0x48] sm:$0xff]  ;;  %v88_v55 = vld [vmem:[#allocation5 + $0x140] sm:$0xff]  ;;  %v621_v56 = vpack.c.bf16 %v105_v49, %v104_v48  ;;  %v75_v59 = vld [vmem:[#allocation5 + $0xd8] sm:$0xff] }
  0x34   :  { %616 = vmatpush3.bf16.msra.mxu1 %v615_v38  ;;  %586 = vmatprep.subr.bf16.mxu0 %v585_v39  ;;  %v89_v57 = vld [vmem:[#allocation5 + $0x148] sm:$0xff]  ;;  %v106_v60 = vld [vmem:[#allocation5 + $0x1d0] sm:$0xff]  ;;  %v107_v61 = vld [vmem:[#allocation5 + $0x1d8] sm:$0xff]  ;;  %v591_v62 = vpack.c.bf16 %v57_v54, %v56_v53  ;;  %v593_v0 = vpack.c.bf16 %v75_v59, %v74_v58 }
  0x35   :  { %618 = vmatprep.subr.bf16.mxu1 %v617_v43  ;;  %v623_v63 = vpack.c.bf16 %v89_v57, %v88_v55  ;;  %v58_v1 = vld [vmem:[#allocation5 + $0x50] sm:$0xff]  ;;  %v59_v2 = vld [vmem:[#allocation5 + $0x58] sm:$0xff]  ;;  %v625_v4 = vpack.c.bf16 %v107_v61, %v106_v60  ;;  %v76_v6 = vld [vmem:[#allocation5 + $0xe0] sm:$0xff]  ;;  %v758_v60 = vmov 0.0  }
  0x36   :  { %v90_v3 = vld [vmem:[#allocation5 + $0x150] sm:$0xff]  ;;  %v91_v5 = vld [vmem:[#allocation5 + $0x158] sm:$0xff]  ;;  %v77_v7 = vld [vmem:[#allocation5 + $0xe8] sm:$0xff]  ;;  %v595_v10 = vpack.c.bf16 %v59_v2, %v58_v1 }
  0x37   :  { %588 = vmatpush3.bf16.msra.mxu0 %v587_v50  ;;  %v108_v8 = vld [vmem:[#allocation5 + $0x1e0] sm:$0xff]  ;;  %v109_v9 = vld [vmem:[#allocation5 + $0x1e8] sm:$0xff]  ;;  %v627_v13 = vpack.c.bf16 %v91_v5, %v90_v3  ;;  %v597_v14 = vpack.c.bf16 %v77_v7, %v76_v6  ;;  %v42_v16 = vld [vmem:[#allocation2 + $0x8] sm:$0xff]  ;;  %v756_v50 = vmov 0.0|0.0  }
  0x38   :  { %620 = vmatpush3.bf16.msra.mxu1 %v619_v51  ;;  %590 = vmatprep.subr.bf16.mxu0 %v589_v52  ;;  %v60_v11 = vld [vmem:[#allocation5 + $0x60] sm:$0xff]  ;;  %v61_v12 = vld [vmem:[#allocation5 + $0x68] sm:$0xff]  ;;  %v629_v18 = vpack.c.bf16 %v109_v9, %v108_v8  ;;  %v78_v20 = vld [vmem:[#allocation5 + $0xf0] sm:$0xff] }
  0x39   :  { %622 = vmatprep.subr.bf16.mxu1 %v621_v56  ;;  %v92_v15 = vld [vmem:[#allocation5 + $0x160] sm:$0xff]  ;;  %v93_v19 = vld [vmem:[#allocation5 + $0x168] sm:$0xff]  ;;  %v79_v21 = vld [vmem:[#allocation5 + $0xf8] sm:$0xff]  ;;  %214 = vmatprep.mubr.f32.mxu0 %v42_v16  ;;  %v599_v24 = vpack.c.bf16 %v61_v12, %v60_v11 }
  0x3a   :  { %v44_v17 = vld [vmem:[#allocation2 + $0x18] sm:$0xff]  ;;  %v110_v22 = vld [vmem:[#allocation5 + $0x1f0] sm:$0xff]  ;;  %v111_v23 = vld [vmem:[#allocation5 + $0x1f8] sm:$0xff]  ;;  %v631_v25 = vpack.c.bf16 %v93_v19, %v92_v15  ;;  %v601_v26 = vpack.c.bf16 %v79_v21, %v78_v20 }
  0x3b   :  { %592 = vmatpush3.bf16.msra.mxu0 %v591_v62  ;;  %284 = vmatprep.mubr.f32.mxu1 %v44_v17  ;;  %v62_v27 = vld [vmem:[#allocation5 + $0x70] sm:$0xff]  ;;  %v63_v28 = vld [vmem:[#allocation5 + $0x78] sm:$0xff]  ;;  %v633_v30 = vpack.c.bf16 %v111_v23, %v110_v22  ;;  %v128_v32 = vld [vmem:[#allocation5 + $0x280] sm:$0xff] }
  0x3c   :  { %624 = vmatpush3.bf16.msra.mxu1 %v623_v63  ;;  %594 = vmatprep.subr.bf16.mxu0 %v593_v0  ;;  %v94_v29 = vld [vmem:[#allocation5 + $0x170] sm:$0xff]  ;;  %v95_v31 = vld [vmem:[#allocation5 + $0x178] sm:$0xff]  ;;  %v129_v33 = vld [vmem:[#allocation5 + $0x288] sm:$0xff]  ;;  %v603_v34 = vpack.c.bf16 %v63_v28, %v62_v27 }
  0x3d   :  { %626 = vmatprep.subr.bf16.mxu1 %v625_v4  ;;  %v635_v35 = vpack.c.bf16 %v95_v31, %v94_v29  ;;  %v637_v36 = vpack.c.bf16 %v129_v33, %v128_v32  ;;  %v112_v37 = vld [vmem:[#allocation5 + $0x200] sm:$0xff]  ;;  %v113_v38 = vld [vmem:[#allocation5 + $0x208] sm:$0xff]  ;;  %v130_v39 = vld [vmem:[#allocation5 + $0x290] sm:$0xff] }
  0x3e   :  { %v131_v40 = vld [vmem:[#allocation5 + $0x298] sm:$0xff]  ;;  %v41_v41 = vld [vmem:[#allocation2] sm:$0xff]  ;;  %v639_v43 = vpack.c.bf16 %v113_v38, %v112_v37  ;;  %v114_v44 = vld [vmem:[#allocation5 + $0x210] sm:$0xff] }
  0x3f   :  { %596 = vmatpush3.bf16.msra.mxu0 %v595_v10  ;;  %v43_v42 = vld [vmem:[#allocation2 + $0x10] sm:$0xff]  ;;  %v641_v45 = vpack.c.bf16 %v131_v40, %v130_v39  ;;  %v132_v47 = vld [vmem:[#allocation5 + $0x2a0] sm:$0xff]  ;;  %v133_v48 = vld [vmem:[#allocation5 + $0x2a8] sm:$0xff] }
  0x40   :  { %628 = vmatpush3.bf16.msra.mxu1 %v627_v13  ;;  %598 = vmatprep.subr.bf16.mxu0 %v597_v14  ;;  %v115_v46 = vld [vmem:[#allocation5 + $0x218] sm:$0xff]  ;;  %v46_v49 = vld [vmem:[#allocation2 + $0x28] sm:$0xff]  ;;  %v144_v51 = vld [vmem:[#allocation5 + $0x300] sm:$0xff]  ;;  %v645_v55 = vpack.c.bf16 %v133_v48, %v132_v47 }
  0x41   :  { %630 = vmatprep.subr.bf16.mxu1 %v629_v18  ;;  %v145_v52 = vld [vmem:[#allocation5 + $0x308] sm:$0xff]  ;;  %v643_v54 = vpack.c.bf16 %v115_v46, %v114_v44  ;;  %v116_v56 = vld [vmem:[#allocation5 + $0x220] sm:$0xff]  ;;  %v134_v58 = vld [vmem:[#allocation5 + $0x2b0] sm:$0xff] }
  0x42   :  { %v670_v53 = vpack.c.bf16 %v145_v52, %v144_v51  ;;  %v117_v57 = vld [vmem:[#allocation5 + $0x228] sm:$0xff]  ;;  %v135_v59 = vld [vmem:[#allocation5 + $0x2b8] sm:$0xff]  ;;  %v118_v0 = vld [vmem:[#allocation5 + $0x230] sm:$0xff] }
  0x43   :  { %600 = vmatpush3.bf16.msra.mxu0 %v599_v24  ;;  %v47_v61 = vld [vmem:[#allocation2 + $0x30] sm:$0xff]  ;;  %v647_v62 = vpack.c.bf16 %v117_v57, %v116_v56  ;;  %v649_v63 = vpack.c.bf16 %v135_v59, %v134_v58  ;;  %v136_v2 = vld [vmem:[#allocation5 + $0x2c0] sm:$0xff]  ;;  %v137_v3 = vld [vmem:[#allocation5 + $0x2c8] sm:$0xff] }
  0x44   :  { %632 = vmatpush3.bf16.msra.mxu1 %v631_v25  ;;  %602 = vmatprep.subr.bf16.mxu0 %v601_v26  ;;  %v119_v1 = vld [vmem:[#allocation5 + $0x238] sm:$0xff]  ;;  %v653_v5 = vpack.c.bf16 %v137_v3, %v136_v2  ;;  %v120_v6 = vld [vmem:[#allocation5 + $0x240] sm:$0xff]  ;;  %v121_v7 = vld [vmem:[#allocation5 + $0x248] sm:$0xff] }
  0x45   :  { %634 = vmatprep.subr.bf16.mxu1 %v633_v30  ;;  %v651_v4 = vpack.c.bf16 %v119_v1, %v118_v0  ;;  %v138_v8 = vld [vmem:[#allocation5 + $0x2d0] sm:$0xff]  ;;  %v139_v9 = vld [vmem:[#allocation5 + $0x2d8] sm:$0xff]  ;;  %v655_v10 = vpack.c.bf16 %v121_v7, %v120_v6  ;;  %v140_v14 = vld [vmem:[#allocation5 + $0x2e0] sm:$0xff] }
  0x46   :  { %v657_v11 = vpack.c.bf16 %v139_v9, %v138_v8  ;;  %v122_v12 = vld [vmem:[#allocation5 + $0x250] sm:$0xff]  ;;  %v123_v13 = vld [vmem:[#allocation5 + $0x258] sm:$0xff]  ;;  %v141_v15 = vld [vmem:[#allocation5 + $0x2e8] sm:$0xff] }
  0x47   :  { %604 = vmatpush3.bf16.msra.mxu0 %v603_v34  ;;  %v659_v16 = vpack.c.bf16 %v123_v13, %v122_v12  ;;  %v661_v17 = vpack.c.bf16 %v141_v15, %v140_v14  ;;  %v124_v18 = vld [vmem:[#allocation5 + $0x260] sm:$0xff]  ;;  %v125_v19 = vld [vmem:[#allocation5 + $0x268] sm:$0xff]  ;;  %v142_v20 = vld [vmem:[#allocation5 + $0x2f0] sm:$0xff] }
  0x48   :  { %636 = vmatpush3.bf16.msra.mxu1 %v635_v35  ;;  %638 = vmatprep.subr.bf16.mxu0 %v637_v36  ;;  %v143_v21 = vld [vmem:[#allocation5 + $0x2f8] sm:$0xff]  ;;  %v663_v22 = vpack.c.bf16 %v125_v19, %v124_v18  ;;  %v126_v24 = vld [vmem:[#allocation5 + $0x270] sm:$0xff]  ;;  %v45_v27 = vld [vmem:[#allocation2 + $0x20] sm:$0xff] }
  0x49   :  { %669 = vmatprep.subr.bf16.mxu1 %v756_v50  ;;  %v665_v23 = vpack.c.bf16 %v143_v21, %v142_v20  ;;  %v127_v25 = vld [vmem:[#allocation5 + $0x278] sm:$0xff] }
  0x4a   :  { %215 = vmatmul.mubr.f32.vlgmr.msra.gmra.mrb[0].mxu0 %v41_v41  ;;  %v667_v26 = vpack.c.bf16 %v127_v25, %v126_v24  ;;  %v457_v41 = vld [vmem:[%s828_s2] ss:$0 sm:$0xff] }
  0x4b   :  { %285 = vmatmul.mubr.f32.vlgmr.msra.gmra.mrb[0].mxu1 %v43_v42  ;;  %640 = vmatpush3.bf16.msra.mxu0 %v639_v43 }
  0x4c   :  { %642 = vmatprep.subr.bf16.mxu0 %v641_v45  ;;  %354 = vmatprep.mubr.f32.mxu0 %v46_v49 }
  0x4d   :  { %671 = vmatpush3.bf16.msra.mxu1 %v670_v53  ;;  %570 = vmatprep.mubr.msk.f32.mxu1 %vm757_vm0, %v758_v60 }
  0x4f   :  { %644 = vmatpush3.bf16.msra.mxu0 %v643_v54 }
  0x50   :  { %646 = vmatprep.subr.bf16.mxu0 %v645_v55  ;;  %571 = vmatmul.mubr.msk.f32.vlgmr.msra.gmra.mrb[2].mxu1 %vm146_vm1, %v47_v61 }
  0x53   :  { %648 = vmatpush3.bf16.msra.mxu0 %v647_v62 }
  0x54   :  { %650 = vmatprep.subr.bf16.mxu0 %v649_v63 }
  0x57   :  { %652 = vmatpush3.bf16.msra.mxu0 %v651_v4 }
  0x58   :  { %654 = vmatprep.subr.bf16.mxu0 %v653_v5 }
  0x5b   :  { %656 = vmatpush3.bf16.msra.mxu0 %v655_v10 }
  0x5c   :  { %658 = vmatprep.subr.bf16.mxu0 %v657_v11 }
  0x5f   :  { %660 = vmatpush3.bf16.msra.mxu0 %v659_v16 }
  0x60   :  { %662 = vmatprep.subr.bf16.mxu0 %v661_v17 }
  0x63   :  { %664 = vmatpush3.bf16.msra.mxu0 %v663_v22 }
  0x64   :  { %666 = vmatprep.subr.bf16.mxu0 %v665_v23 }
  0x67   :  { %668 = vmatpush3.bf16.msra.mxu0 %v667_v26 }
  0x6a   :  { %355 = vmatmul.mubr.f32.vlgmr.msra.gmra.mrb[2].mxu0 %v45_v27 }
 0x11d   :  { %v490_v28 = vpop.f32.mrb[0].mxu0 }
 0x11e   :  { %v525_v29 = vpop.f32.mrb[0].mxu1  ;;  %v491_v30 = vpop.f32.mrb[1].mxu0 }
 0x11f   :  { %v492_v31 = vadd.f32 %v491_v30, %v490_v28  ;;  %v526_v32 = vpop.f32.mrb[1].mxu1 }
 0x120   :  { %v527_v33 = vadd.f32 %v526_v32, %v525_v29 }
 0x122   :  { %v287_v34 = vadd.f32 %v527_v33, %v492_v31 }
 0x123   :  { %v426_v35 = vpop.f32.mrb[2].mxu1 }
 0x124   :  { %v572_v36 = vpop.f32.mrb[3].mxu1 }
 0x13d   :  { %v560_v37 = vpop.f32.mrb[2].mxu0 }
 0x13e   :  { %v561_v38 = vpop.f32.mrb[3].mxu0 }
 0x13f   :  { %v562_v39 = vadd.f32 %v561_v38, %v560_v37 }
 0x141   :  { %v357_v40 = vadd.f32 %v562_v39, %v287_v34 }
 0x143   :  { %v427_v42 = vadd.f32 %v426_v35, %v357_v40 }
 0x145   :  { %v437_v43 = vadd.f32 %v457_v41, %v427_v42 }
 0x147   :  { %439 = vst.msk [vmem:[#allocation7] sm:$0xff] %vm438_vm2, %v437_v43 }
 0x148   :  { %735 = shalt.err (!%p732_p6)
}
 0x149   :  { %s736_s16 = scalar_lea.hbm %s829_s3, 128 }
 0x14a   :  { %p737_p7 = scmp.ne.s32.totalorder %s829_s3, %s736_s16  ;;  %p740_p8 = scmp.lt.u32.totalorder %s736_s16, %s829_s3 }
 0x14c   :  { %p742_p9 = pnand %p740_p8, %p737_p7 }
 0x14e   :  { %745 = shalt.err (!%p742_p9)
}
 0x14f   :  { %449 = dma.vmem_to_hbm [thread:$0]  %s447_s12, 128, %s829_s3, [#allocation4]  }
 0x150   :  { %750 = dma.done.wait [#allocation4], 128  }
 0x151   :  { %751 = vsyncadd [#allocation4], 4294967168 }
 0x152   :  { %453 = vsyncpa [#allocation3], 1 }
 0x153   :  { %454 = vsyncpa [#allocation6], 1 }
 0x154   :  { %455 = vsyncpa [#allocation4], 1 }

</bundles_post_ra>
